<compile_context>
chip_gen: v6e
topology: v6e:2x2x1
jax: 0.10.0
libtpu: 0.0.40
codegen_flags: <defaults>
</compile_context>

<pallas_src>
import jax
import jax.numpy as jnp
from jax.experimental import pallas as pl
from jax.experimental.pallas import tpu as pltpu

# ---- Configuration (module defaults, small batch) ----
BATCH = 2
IMAGE_CHANNELS = 3
IMAGE_SIZE = 24
KERNEL_SIZE = 3
NUM_FILTERS = 64
STRIDE = 2

OH = (IMAGE_SIZE - KERNEL_SIZE) // STRIDE + 1      # 11  (valid conv)
OW = OH
PH = (OH - KERNEL_SIZE) // STRIDE + 1              # 5   (valid maxpool)
PW = PH
KKC = KERNEL_SIZE * KERNEL_SIZE * IMAGE_CHANNELS   # 27
KKC_PAD = 32                                       # pad contracting dim 27 -> 32
NWIN = PH * PW                                     # 25 pool windows per sample
GROUP = BATCH * NWIN                               # 50 rows per window-offset group
GROUP_PAD = 56                                     # padded to a multiple of 8 sublanes
NOFF = KERNEL_SIZE * KERNEL_SIZE                   # 9 pooling-window offsets
ROWS = NOFF * GROUP_PAD                            # 504 total matmul rows
FLAT = NUM_FILTERS * PH * PW                       # 1600 actual flattened features


def discriminator_kernel(patches_ref, wc_ref, bc_ref, wf_ref, sel_ref, bf_ref, out_ref):
    """Fused conv(one im2col matmul) + ReLU + MaxPool + Linear + Sigmoid.

    patches_ref: (ROWS, KKC_PAD)       all im2col patches, 9 offset groups of GROUP_PAD rows
    wc_ref:      (KKC_PAD, F)          conv weight (zero-padded contracting dim)
    bc_ref:      (1, F)                conv bias
    wf_ref:      (GROUP_PAD, F)        fc weight tiled per batch, rows b*25 + (ph*PW+pw)
    sel_ref:     (B, GROUP_PAD)        0/1 batch-segment selector for the FC reduction
    bf_ref:      (1, 1)                fc bias
    out_ref:     (B, 1)
    """
    # One batched conv matmul covering (batch x pool-window x window-offset).
    conv = jnp.dot(patches_ref[...], wc_ref[...], preferred_element_type=jnp.float32)
    conv = jnp.maximum(conv + bc_ref[...], 0.0)                      # bias + ReLU, (ROWS, F)

    # MaxPool(3, stride=2): max over the 9 aligned offset slabs.
    pooled = conv[0:GROUP_PAD, :]
    for g in range(1, NOFF):
        pooled = jnp.maximum(pooled, conv[g * GROUP_PAD:(g + 1) * GROUP_PAD, :])

    # Linear(FLAT, 1): bulk multiply, batch segment-sum via a tiny matmul, lane reduce.
    prod = pooled * wf_ref[...]                                      # (GROUP_PAD, F)
    grouped = jnp.dot(sel_ref[...], prod,
                      preferred_element_type=jnp.float32)            # (B, F)
    logits = jnp.sum(grouped, axis=1, keepdims=True) + bf_ref[...]   # (B, 1)
    out_ref[...] = 1.0 / (1.0 + jnp.exp(-logits))                    # sigmoid, single store


def discriminator_forward(x_nchw, wc4, bc, wfc, bfc):
    # Glue: NCHW -> NHWC and im2col patch extraction (pure indexing/reshape, done by XLA).
    x = jnp.transpose(x_nchw, (0, 2, 3, 1))                          # (B, H, W, C)
    cols = []
    for i in range(KERNEL_SIZE):
        for j in range(KERNEL_SIZE):
            cols.append(x[:, i:i + STRIDE * (OH - 1) + 1:STRIDE,
                          j:j + STRIDE * (OW - 1) + 1:STRIDE, :])    # (B, OH, OW, C)
    patches = jnp.stack(cols, axis=3)                                # (B, OH, OW, K*K, C)
    patches = patches.reshape(BATCH, OH, OW, KKC)                    # feature order (kh, kw, cin)

    # For each pool-window offset (di, dj), gather the conv patches feeding every pool
    # window; pad rows 50->56 and features 27->32; stack the 9 groups into one matrix.
    groups = []
    for di in range(KERNEL_SIZE):
        for dj in range(KERNEL_SIZE):
            sub = patches[:, di:di + STRIDE * (PH - 1) + 1:STRIDE,
                          dj:dj + STRIDE * (PW - 1) + 1:STRIDE, :]   # (B, PH, PW, KKC)
            g = sub.reshape(GROUP, KKC)                              # row = b*25 + ph*PW + pw
            g = jnp.pad(g, ((0, GROUP_PAD - GROUP), (0, KKC_PAD - KKC)))
            groups.append(g)
    mega = jnp.concatenate(groups, axis=0)                           # (ROWS, KKC_PAD)

    wc = jnp.pad(wc4.reshape(KKC, NUM_FILTERS),
                 ((0, KKC_PAD - KKC), (0, 0)))                       # (KKC_PAD, F)
    bc2 = bc.reshape(1, NUM_FILTERS)
    wf = wfc.reshape(NWIN, NUM_FILTERS)                              # rows in (ph, pw) order
    wf_tiled = jnp.pad(jnp.concatenate([wf] * BATCH, axis=0),
                       ((0, GROUP_PAD - GROUP), (0, 0)))             # (GROUP_PAD, F)
    sel = (jnp.arange(GROUP_PAD)[None, :] // NWIN
           == jnp.arange(BATCH)[:, None]).astype(jnp.float32)        # (B, GROUP_PAD)
    bf2 = bfc.reshape(1, 1)

    return pl.pallas_call(
        discriminator_kernel,
        out_shape=jax.ShapeDtypeStruct((BATCH, 1), jnp.float32),
        grid=(1,),
        in_specs=[
            pl.BlockSpec((ROWS, KKC_PAD), lambda i: (0, 0)),
            pl.BlockSpec((KKC_PAD, NUM_FILTERS), lambda i: (0, 0)),
            pl.BlockSpec((1, NUM_FILTERS), lambda i: (0, 0)),
            pl.BlockSpec((GROUP_PAD, NUM_FILTERS), lambda i: (0, 0)),
            pl.BlockSpec((BATCH, GROUP_PAD), lambda i: (0, 0)),
            pl.BlockSpec((1, 1), lambda i: (0, 0)),
        ],
        out_specs=pl.BlockSpec((BATCH, 1), lambda i: (0, 0)),
        compiler_params=pltpu.CompilerParams(dimension_semantics=("arbitrary",)),
    )(mega, wc, bc2, wf_tiled, sel, bf2)


def reference_forward(x_nchw, wc4, bc, wfc, bfc):
    """Pure-JAX reference (same math) for verification."""
    x = jnp.transpose(x_nchw, (0, 2, 3, 1))
    conv = jax.lax.conv_general_dilated(
        x, wc4, window_strides=(STRIDE, STRIDE), padding="VALID",
        dimension_numbers=("NHWC", "HWIO", "NHWC"))
    conv = jax.nn.relu(conv + bc.reshape(1, 1, 1, -1))
    pooled = jax.lax.reduce_window(
        conv, -jnp.inf, jax.lax.max,
        window_dimensions=(1, KERNEL_SIZE, KERNEL_SIZE, 1),
        window_strides=(1, STRIDE, STRIDE, 1), padding="VALID")
    flat = pooled.reshape(BATCH, FLAT)                               # (ph, pw, f) order
    logits = flat @ wfc.reshape(FLAT, 1) + bfc.reshape(1, 1)
    return jax.nn.sigmoid(logits)


if __name__ == "__main__":
    key = jax.random.PRNGKey(0)
    k1, k2, k3, k4, k5 = jax.random.split(key, 5)

    x = jax.random.normal(
        k1, (BATCH, IMAGE_CHANNELS, IMAGE_SIZE, IMAGE_SIZE), jnp.float32)
    # Deterministic synthetic parameters (shapes implied by the module).
    wc4 = 0.1 * jax.random.normal(
        k2, (KERNEL_SIZE, KERNEL_SIZE, IMAGE_CHANNELS, NUM_FILTERS), jnp.float32)
    bc = 0.1 * jax.random.normal(k3, (NUM_FILTERS,), jnp.float32)
    wfc = 0.01 * jax.random.normal(k4, (PH, PW, NUM_FILTERS), jnp.float32)
    bfc = 0.01 * jax.random.normal(k5, (1,), jnp.float32)

    out = discriminator_forward(x, wc4, bc, wfc, bfc)
    out = jax.block_until_ready(out)

    ref = reference_forward(x, wc4, bc, wfc, bfc)
    assert out.shape == (BATCH, 1), out.shape
    assert jnp.allclose(out, ref, rtol=1e-4, atol=1e-5), (out, ref)
    print("KERNEL_OK")
</pallas_src>

<mosaic_0001>
module attributes {stable_mosaic.version = 11 : i64} {
  func.func @discriminator_kernel(%arg0: i32, %arg1: memref<504x32xf32, #tpu.memory_space<vmem>>, %arg2: memref<32x64xf32, #tpu.memory_space<vmem>>, %arg3: memref<1x64xf32, #tpu.memory_space<vmem>>, %arg4: memref<56x64xf32, #tpu.memory_space<vmem>>, %arg5: memref<2x56xf32, #tpu.memory_space<vmem>>, %arg6: memref<1x1xf32, #tpu.memory_space<vmem>>, %arg7: memref<2x1xf32, #tpu.memory_space<vmem>>) attributes {dimension_semantics = [#tpu.dimension_semantics<arbitrary>], iteration_bounds = array<i64: 1>, scalar_prefetch = 0 : i64, scratch_operands = 0 : i64, tpu.core_type = #tpu.core_type<tc>, window_params = [{pipeline_mode = #tpu.pipeline_mode<synchronous>, transform_indices = @transform_0, window_bounds = array<i64: 504, 32>}, {pipeline_mode = #tpu.pipeline_mode<synchronous>, transform_indices = @transform_1, window_bounds = array<i64: 32, 64>}, {pipeline_mode = #tpu.pipeline_mode<synchronous>, transform_indices = @transform_2, window_bounds = array<i64: 1, 64>}, {pipeline_mode = #tpu.pipeline_mode<synchronous>, transform_indices = @transform_3, window_bounds = array<i64: 56, 64>}, {pipeline_mode = #tpu.pipeline_mode<synchronous>, transform_indices = @transform_4, window_bounds = array<i64: 2, 56>}, {pipeline_mode = #tpu.pipeline_mode<synchronous>, transform_indices = @transform_5, window_bounds = array<i64: 1, 1>}, {pipeline_mode = #tpu.pipeline_mode<synchronous>, transform_indices = @transform_6, window_bounds = array<i64: 2, 1>}]} {
    %c0 = arith.constant 0 : index
    %c0_0 = arith.constant 0 : index
    %0 = vector.load %arg1[%c0, %c0_0] : memref<504x32xf32, #tpu.memory_space<vmem>>, vector<504x32xf32>
    %c0_1 = arith.constant 0 : index
    %c0_2 = arith.constant 0 : index
    %1 = vector.load %arg2[%c0_1, %c0_2] : memref<32x64xf32, #tpu.memory_space<vmem>>, vector<32x64xf32>
    %cst = arith.constant dense<0.000000e+00> : vector<504x64xf32>
    %2 = tpu.matmul %0, %1, %cst {dimension_numbers = #tpu.dot_dimension_numbers<[1], [0], [0], [1], [0, 0, 1, 1], [], []>} : vector<504x32xf32>, vector<32x64xf32>, vector<504x64xf32> -> vector<504x64xf32>
    %c0_3 = arith.constant 0 : index
    %c0_4 = arith.constant 0 : index
    %3 = vector.load %arg3[%c0_3, %c0_4] : memref<1x64xf32, #tpu.memory_space<vmem>>, vector<1x64xf32>
    %4 = vector.broadcast %3 : vector<1x64xf32> to vector<504x64xf32>
    %5 = arith.addf %2, %4 : vector<504x64xf32>
    %cst_5 = arith.constant 0.000000e+00 : f32
    %6 = vector.broadcast %cst_5 : f32 to vector<504x64xf32>
    %7 = arith.maximumf %5, %6 : vector<504x64xf32>
    %8 = vector.extract_strided_slice %7 {offsets = [0, 0], sizes = [56, 64], strides = [1, 1]} : vector<504x64xf32> to vector<56x64xf32>
    %9 = vector.extract_strided_slice %7 {offsets = [56, 0], sizes = [56, 64], strides = [1, 1]} : vector<504x64xf32> to vector<56x64xf32>
    %10 = arith.maximumf %8, %9 : vector<56x64xf32>
    %11 = vector.extract_strided_slice %7 {offsets = [112, 0], sizes = [56, 64], strides = [1, 1]} : vector<504x64xf32> to vector<56x64xf32>
    %12 = arith.maximumf %10, %11 : vector<56x64xf32>
    %13 = vector.extract_strided_slice %7 {offsets = [168, 0], sizes = [56, 64], strides = [1, 1]} : vector<504x64xf32> to vector<56x64xf32>
    %14 = arith.maximumf %12, %13 : vector<56x64xf32>
    %15 = vector.extract_strided_slice %7 {offsets = [224, 0], sizes = [56, 64], strides = [1, 1]} : vector<504x64xf32> to vector<56x64xf32>
    %16 = arith.maximumf %14, %15 : vector<56x64xf32>
    %17 = vector.extract_strided_slice %7 {offsets = [280, 0], sizes = [56, 64], strides = [1, 1]} : vector<504x64xf32> to vector<56x64xf32>
    %18 = arith.maximumf %16, %17 : vector<56x64xf32>
    %19 = vector.extract_strided_slice %7 {offsets = [336, 0], sizes = [56, 64], strides = [1, 1]} : vector<504x64xf32> to vector<56x64xf32>
    %20 = arith.maximumf %18, %19 : vector<56x64xf32>
    %21 = vector.extract_strided_slice %7 {offsets = [392, 0], sizes = [56, 64], strides = [1, 1]} : vector<504x64xf32> to vector<56x64xf32>
    %22 = arith.maximumf %20, %21 : vector<56x64xf32>
    %23 = vector.extract_strided_slice %7 {offsets = [448, 0], sizes = [56, 64], strides = [1, 1]} : vector<504x64xf32> to vector<56x64xf32>
    %24 = arith.maximumf %22, %23 : vector<56x64xf32>
    %c0_6 = arith.constant 0 : index
    %c0_7 = arith.constant 0 : index
    %25 = vector.load %arg4[%c0_6, %c0_7] : memref<56x64xf32, #tpu.memory_space<vmem>>, vector<56x64xf32>
    %26 = arith.mulf %24, %25 : vector<56x64xf32>
    %c0_8 = arith.constant 0 : index
    %c0_9 = arith.constant 0 : index
    %27 = vector.load %arg5[%c0_8, %c0_9] : memref<2x56xf32, #tpu.memory_space<vmem>>, vector<2x56xf32>
    %cst_10 = arith.constant dense<0.000000e+00> : vector<2x64xf32>
    %28 = tpu.matmul %27, %26, %cst_10 {dimension_numbers = #tpu.dot_dimension_numbers<[1], [0], [0], [1], [0, 0, 1, 1], [], []>} : vector<2x56xf32>, vector<56x64xf32>, vector<2x64xf32> -> vector<2x64xf32>
    %cst_11 = arith.constant dense<0.000000e+00> : vector<2xf32>
    %29 = vector.multi_reduction <add>, %28, %cst_11 [1] : vector<2x64xf32> to vector<2xf32>
    %30 = vector.shape_cast %29 : vector<2xf32> to vector<2x1xf32>
    %c0_12 = arith.constant 0 : index
    %c0_13 = arith.constant 0 : index
    %31 = vector.load %arg6[%c0_12, %c0_13] : memref<1x1xf32, #tpu.memory_space<vmem>>, vector<1x1xf32>
    %32 = vector.broadcast %31 : vector<1x1xf32> to vector<2x1xf32>
    %33 = arith.addf %30, %32 : vector<2x1xf32>
    %cst_14 = arith.constant 0.000000e+00 : f32
    %34 = vector.broadcast %cst_14 : f32 to vector<2x1xf32>
    %35 = arith.subf %34, %33 : vector<2x1xf32>
    %36 = math.exp %35 : vector<2x1xf32>
    %cst_15 = arith.constant 1.000000e+00 : f32
    %37 = vector.broadcast %cst_15 : f32 to vector<2x1xf32>
    %38 = arith.addf %37, %36 : vector<2x1xf32>
    %cst_16 = arith.constant 1.000000e+00 : f32
    %39 = vector.broadcast %cst_16 : f32 to vector<2x1xf32>
    %40 = arith.divf %39, %38 : vector<2x1xf32>
    %c0_17 = arith.constant 0 : index
    %c0_18 = arith.constant 0 : index
    %41 = vector.load %arg7[%c0_17, %c0_18] : memref<2x1xf32, #tpu.memory_space<vmem>>, vector<2x1xf32>
    tpu.vector_store %arg7[%c0_17, %c0_18], %40 {strides = array<i32>} : memref<2x1xf32, #tpu.memory_space<vmem>>, vector<2x1xf32>,
    return
  }
  func.func @transform_0(%arg0: i32) -> (i32, i32) {
    %c0_i32 = arith.constant 0 : i32
    %c0_i32_0 = arith.constant 0 : i32
    %c0_i32_1 = arith.constant 0 : i32
    return %c0_i32, %c0_i32_0 : i32, i32
  }
  func.func @transform_1(%arg0: i32) -> (i32, i32) {
    %c0_i32 = arith.constant 0 : i32
    %c0_i32_0 = arith.constant 0 : i32
    %c0_i32_1 = arith.constant 0 : i32
    return %c0_i32, %c0_i32_0 : i32, i32
  }
  func.func @transform_2(%arg0: i32) -> (i32, i32) {
    %c0_i32 = arith.constant 0 : i32
    %c0_i32_0 = arith.constant 0 : i32
    %c0_i32_1 = arith.constant 0 : i32
    return %c0_i32, %c0_i32_0 : i32, i32
  }
  func.func @transform_3(%arg0: i32) -> (i32, i32) {
    %c0_i32 = arith.constant 0 : i32
    %c0_i32_0 = arith.constant 0 : i32
    %c0_i32_1 = arith.constant 0 : i32
    return %c0_i32, %c0_i32_0 : i32, i32
  }
  func.func @transform_4(%arg0: i32) -> (i32, i32) {
    %c0_i32 = arith.constant 0 : i32
    %c0_i32_0 = arith.constant 0 : i32
    %c0_i32_1 = arith.constant 0 : i32
    return %c0_i32, %c0_i32_0 : i32, i32
  }
  func.func @transform_5(%arg0: i32) -> (i32, i32) {
    %c0_i32 = arith.constant 0 : i32
    %c0_i32_0 = arith.constant 0 : i32
    %c0_i32_1 = arith.constant 0 : i32
    return %c0_i32, %c0_i32_0 : i32, i32
  }
  func.func @transform_6(%arg0: i32) -> (i32, i32) {
    %c0_i32 = arith.constant 0 : i32
    %c0_i32_0 = arith.constant 0 : i32
    %c0_i32_1 = arith.constant 0 : i32
    return %c0_i32, %c0_i32_0 : i32, i32
  }
}

</mosaic_0001>

<bundles_post_ra>
// kernel: tpu_custom_call.1
= control target key start
LH: loop header
LB: loop body
LE: loop exit
PB: predicated region body
PF: predicated region fallthrough
CT: control target
= control target key end

     0   :  { %v1996_v0 = vmov 0.0   ;;  %vm99_vm0 = vcmask 261120   ;;  %vm1271_vm1 = vmmov 0   ;;  %vm803_vm2 = vcmask 457728   ;;  %s1989_s1 = inlined_call_operand.vmem [shape: f32[32,64], index: 1, kind: input, shape index: {}]   ;;  %s1990_s0 = inlined_call_operand.vmem [shape: f32[504,32], index: 0, kind: input, shape index: {}]   ;;  %s1991_s2 = inlined_call_operand.vmem [shape: f32[1,64], index: 2, kind: input, shape index: {}]   ;;  %s1992_s3 = inlined_call_operand.vmem [shape: f32[56,64], index: 3, kind: input, shape index: {}]   ;;  %s1993_s4 = inlined_call_operand.vmem [shape: f32[2,56], index: 4, kind: input, shape index: {}]   ;;  %s1994_s5 = inlined_call_operand.<no memory space> [shape: f32[1,1], index: 5, kind: input, shape index: {}]   ;;  %s1995_s6 = inlined_call_operand.vmem [shape: f32[2,1], index: 6, kind: output, shape index: {}]  }
   0x1   :  { %1042 = vmatprep.subr.mxu0 %v1996_v0  ;;  %1256 = vmatprep.subr.mxu1 %v1996_v0  ;;  %v91_v1 = vld [vmem:[%s1989_s1 + $0x18] sm:$0xff]  ;;  %v90_v2 = vld [vmem:[%s1989_s1 + $0x10] sm:$0xff]  ;;  %v89_v3 = vld [vmem:[%s1989_s1 + $0x8] sm:$0xff]  ;;  %vm877_vm3 = vcmask 517120   ;;  %vm895_vm4 = vcmask 1024  }
   0x2   :  { %1043 = vmatpush3.msra.mxu0 %v91_v1  ;;  %1260 = vmatpush3.msra.mxu1 %v91_v1  ;;  %v88_v4 = vld [vmem:[%s1989_s1] sm:$0xff]  ;;  %v26_v7 = vld [vmem:[%s1990_s0 + $0x8] sm:$0xff]  ;;  %v27_v9 = vld [vmem:[%s1990_s0 + $0x10] sm:$0xff] }
   0x3   :  { %1044 = vmatprep.subr.mxu0 %v1996_v0  ;;  %1257 = vmatprep.subr.mxu1 %v1996_v0  ;;  %v25_v5 = vld [vmem:[%s1990_s0] sm:$0xff]  ;;  %v58_v8 = vld [vmem:[%s1990_s0 + $0x108] sm:$0xff]  ;;  %v59_v10 = vld [vmem:[%s1990_s0 + $0x110] sm:$0xff] }
   0x4   :  { %1045 = vmatpush3.msra.mxu0 %v90_v2  ;;  %1261 = vmatpush3.msra.mxu1 %v90_v2  ;;  %v57_v6 = vld [vmem:[%s1990_s0 + $0x100] sm:$0xff]  ;;  %v28_v11 = vld [vmem:[%s1990_s0 + $0x18] sm:$0xff]  ;;  %v30_v15 = vld [vmem:[%s1990_s0 + $0x28] sm:$0xff] }
   0x5   :  { %1046 = vmatprep.subr.mxu0 %v1996_v0  ;;  %1258 = vmatprep.subr.mxu1 %v1996_v0  ;;  %v60_v12 = vld [vmem:[%s1990_s0 + $0x118] sm:$0xff]  ;;  %v29_v13 = vld [vmem:[%s1990_s0 + $0x20] sm:$0xff]  ;;  %v62_v16 = vld [vmem:[%s1990_s0 + $0x128] sm:$0xff] }
   0x6   :  { %1047 = vmatpush3.msra.mxu0 %v89_v3  ;;  %1262 = vmatpush3.msra.mxu1 %v89_v3  ;;  %v61_v14 = vld [vmem:[%s1990_s0 + $0x120] sm:$0xff]  ;;  %v31_v17 = vld [vmem:[%s1990_s0 + $0x30] sm:$0xff]  ;;  %v32_v19 = vld [vmem:[%s1990_s0 + $0x38] sm:$0xff] }
   0x7   :  { %1048 = vmatprep.subr.mxu0 %v1996_v0  ;;  %1259 = vmatprep.subr.mxu1 %v1996_v0  ;;  %v63_v18 = vld [vmem:[%s1990_s0 + $0x130] sm:$0xff]  ;;  %v64_v20 = vld [vmem:[%s1990_s0 + $0x138] sm:$0xff]  ;;  %v33_v21 = vld [vmem:[%s1990_s0 + $0x40] sm:$0xff] }
   0x8   :  { %1049 = vmatpush3.msra.mxu0 %v88_v4  ;;  %1263 = vmatpush3.msra.mxu1 %v88_v4  ;;  %v65_v22 = vld [vmem:[%s1990_s0 + $0x140] sm:$0xff]  ;;  %v34_v23 = vld [vmem:[%s1990_s0 + $0x48] sm:$0xff]  ;;  %v35_v25 = vld [vmem:[%s1990_s0 + $0x50] sm:$0xff] }
   0x9   :  { %1050 = vmatprep.mubr.msk.f32.mxu0 %vm1271_vm1, %v1996_v0  ;;  %1146 = vmatprep.mubr.msk.f32.mxu1 %vm1271_vm1, %v1996_v0  ;;  %v66_v24 = vld [vmem:[%s1990_s0 + $0x148] sm:$0xff]  ;;  %v67_v26 = vld [vmem:[%s1990_s0 + $0x150] sm:$0xff]  ;;  %v36_v27 = vld [vmem:[%s1990_s0 + $0x58] sm:$0xff] }
   0xa   :  { %1051 = vmatmul.mubr.msk.f32.vlgmr.msra.gmra.mxu0 %vm99_vm0, %v25_v5  ;;  %1147 = vmatmul.mubr.msk.f32.vlgmr.msra.gmra.mxu1 %vm99_vm0, %v57_v6  ;;  %v68_v28 = vld [vmem:[%s1990_s0 + $0x158] sm:$0xff]  ;;  %v37_v29 = vld [vmem:[%s1990_s0 + $0x60] sm:$0xff]  ;;  %v38_v31 = vld [vmem:[%s1990_s0 + $0x68] sm:$0xff] }
   0xb   :  { %1053 = vmatprep.mubr.msk.f32.mxu0 %vm1271_vm1, %v1996_v0  ;;  %1149 = vmatprep.mubr.msk.f32.mxu1 %vm1271_vm1, %v1996_v0  ;;  %v69_v30 = vld [vmem:[%s1990_s0 + $0x160] sm:$0xff]  ;;  %v70_v32 = vld [vmem:[%s1990_s0 + $0x168] sm:$0xff]  ;;  %v39_v33 = vld [vmem:[%s1990_s0 + $0x70] sm:$0xff] }
   0xc   :  { %1239 = vmatprep.subr.mxu1 %v1996_v0  ;;  %v71_v34 = vld [vmem:[%s1990_s0 + $0x170] sm:$0xff]  ;;  %v40_v35 = vld [vmem:[%s1990_s0 + $0x78] sm:$0xff]  ;;  %v41_v37 = vld [vmem:[%s1990_s0 + $0x80] sm:$0xff] }
   0xd   :  { %v72_v36 = vld [vmem:[%s1990_s0 + $0x178] sm:$0xff]  ;;  %v73_v38 = vld [vmem:[%s1990_s0 + $0x180] sm:$0xff]  ;;  %v42_v39 = vld [vmem:[%s1990_s0 + $0x88] sm:$0xff] }
   0xe   :  { %1054 = vmatmul.mubr.msk.f32.gmra.mxu0 %vm99_vm0, %v26_v7  ;;  %1150 = vmatmul.mubr.msk.f32.gmra.mxu1 %vm99_vm0, %v58_v8  ;;  %v74_v40 = vld [vmem:[%s1990_s0 + $0x188] sm:$0xff]  ;;  %v43_v41 = vld [vmem:[%s1990_s0 + $0x90] sm:$0xff]  ;;  %v44_v43 = vld [vmem:[%s1990_s0 + $0x98] sm:$0xff] }
   0xf   :  { %1056 = vmatprep.mubr.msk.f32.mxu0 %vm1271_vm1, %v1996_v0  ;;  %1152 = vmatprep.mubr.msk.f32.mxu1 %vm1271_vm1, %v1996_v0  ;;  %v75_v42 = vld [vmem:[%s1990_s0 + $0x190] sm:$0xff]  ;;  %v76_v44 = vld [vmem:[%s1990_s0 + $0x198] sm:$0xff]  ;;  %v45_v45 = vld [vmem:[%s1990_s0 + $0xa0] sm:$0xff] }
  0x10   :  { %v77_v46 = vld [vmem:[%s1990_s0 + $0x1a0] sm:$0xff]  ;;  %v46_v47 = vld [vmem:[%s1990_s0 + $0xa8] sm:$0xff]  ;;  %v47_v49 = vld [vmem:[%s1990_s0 + $0xb0] sm:$0xff] }
  0x11   :  { %v78_v48 = vld [vmem:[%s1990_s0 + $0x1a8] sm:$0xff]  ;;  %v79_v50 = vld [vmem:[%s1990_s0 + $0x1b0] sm:$0xff]  ;;  %v48_v51 = vld [vmem:[%s1990_s0 + $0xb8] sm:$0xff] }
  0x12   :  { %1057 = vmatmul.mubr.msk.f32.gmra.mxu0 %vm99_vm0, %v27_v9  ;;  %1153 = vmatmul.mubr.msk.f32.gmra.mxu1 %vm99_vm0, %v59_v10  ;;  %v80_v52 = vld [vmem:[%s1990_s0 + $0x1b8] sm:$0xff]  ;;  %v49_v53 = vld [vmem:[%s1990_s0 + $0xc0] sm:$0xff]  ;;  %v50_v55 = vld [vmem:[%s1990_s0 + $0xc8] sm:$0xff] }
  0x13   :  { %1059 = vmatprep.mubr.msk.f32.mxu0 %vm1271_vm1, %v1996_v0  ;;  %1155 = vmatprep.mubr.msk.f32.mxu1 %vm1271_vm1, %v1996_v0  ;;  %v81_v54 = vld [vmem:[%s1990_s0 + $0x1c0] sm:$0xff]  ;;  %v82_v56 = vld [vmem:[%s1990_s0 + $0x1c8] sm:$0xff]  ;;  %v51_v57 = vld [vmem:[%s1990_s0 + $0xd0] sm:$0xff] }
  0x14   :  { %v83_v58 = vld [vmem:[%s1990_s0 + $0x1d0] sm:$0xff]  ;;  %v52_v59 = vld [vmem:[%s1990_s0 + $0xd8] sm:$0xff]  ;;  %v53_v61 = vld [vmem:[%s1990_s0 + $0xe0] sm:$0xff] }
  0x15   :  { %v84_v60 = vld [vmem:[%s1990_s0 + $0x1d8] sm:$0xff]  ;;  %v85_v62 = vld [vmem:[%s1990_s0 + $0x1e0] sm:$0xff]  ;;  %v54_v63 = vld [vmem:[%s1990_s0 + $0xe8] sm:$0xff] }
  0x16   :  { %1060 = vmatmul.mubr.msk.f32.gmra.mxu0 %vm99_vm0, %v28_v11  ;;  %1156 = vmatmul.mubr.msk.f32.gmra.mxu1 %vm99_vm0, %v60_v12  ;;  %v86_v1 = vld [vmem:[%s1990_s0 + $0x1e8] sm:$0xff]  ;;  %v55_v2 = vld [vmem:[%s1990_s0 + $0xf0] sm:$0xff]  ;;  %v56_v4 = vld [vmem:[%s1990_s0 + $0xf8] sm:$0xff] }
  0x17   :  { %1062 = vmatprep.mubr.msk.f32.mxu0 %vm1271_vm1, %v1996_v0  ;;  %1158 = vmatprep.mubr.msk.f32.mxu1 %vm1271_vm1, %v1996_v0  ;;  %v87_v3 = vld [vmem:[%s1990_s0 + $0x1f0] sm:$0xff] }
  0x1a   :  { %1063 = vmatmul.mubr.msk.f32.gmra.mxu0 %vm99_vm0, %v29_v13  ;;  %1159 = vmatmul.mubr.msk.f32.gmra.mxu1 %vm99_vm0, %v61_v14 }
  0x1b   :  { %1065 = vmatprep.mubr.msk.f32.mxu0 %vm1271_vm1, %v1996_v0  ;;  %1161 = vmatprep.mubr.msk.f32.mxu1 %vm1271_vm1, %v1996_v0 }
  0x1e   :  { %1066 = vmatmul.mubr.msk.f32.gmra.mxu0 %vm99_vm0, %v30_v15  ;;  %1162 = vmatmul.mubr.msk.f32.gmra.mxu1 %vm99_vm0, %v62_v16 }
  0x1f   :  { %1068 = vmatprep.mubr.msk.f32.mxu0 %vm1271_vm1, %v1996_v0  ;;  %1164 = vmatprep.mubr.msk.f32.mxu1 %vm1271_vm1, %v1996_v0 }
  0x22   :  { %1069 = vmatmul.mubr.msk.f32.gmra.mxu0 %vm99_vm0, %v31_v17  ;;  %1165 = vmatmul.mubr.msk.f32.gmra.mxu1 %vm99_vm0, %v63_v18 }
  0x23   :  { %1071 = vmatprep.mubr.msk.f32.mxu0 %vm1271_vm1, %v1996_v0  ;;  %1167 = vmatprep.mubr.msk.f32.mxu1 %vm1271_vm1, %v1996_v0 }
  0x26   :  { %1072 = vmatmul.mubr.msk.f32.gmra.mxu0 %vm99_vm0, %v32_v19  ;;  %1168 = vmatmul.mubr.msk.f32.gmra.mxu1 %vm99_vm0, %v64_v20 }
  0x27   :  { %1074 = vmatprep.mubr.msk.f32.mxu0 %vm1271_vm1, %v1996_v0  ;;  %1170 = vmatprep.mubr.msk.f32.mxu1 %vm1271_vm1, %v1996_v0 }
  0x2a   :  { %1075 = vmatmul.mubr.msk.f32.gmra.mxu0 %vm99_vm0, %v33_v21  ;;  %1171 = vmatmul.mubr.msk.f32.gmra.mxu1 %vm99_vm0, %v65_v22 }
  0x2b   :  { %1077 = vmatprep.mubr.msk.f32.mxu0 %vm1271_vm1, %v1996_v0  ;;  %1173 = vmatprep.mubr.msk.f32.mxu1 %vm1271_vm1, %v1996_v0 }
  0x2e   :  { %1078 = vmatmul.mubr.msk.f32.gmra.mxu0 %vm99_vm0, %v34_v23  ;;  %1174 = vmatmul.mubr.msk.f32.gmra.mxu1 %vm99_vm0, %v66_v24 }
  0x2f   :  { %1080 = vmatprep.mubr.msk.f32.mxu0 %vm1271_vm1, %v1996_v0  ;;  %1176 = vmatprep.mubr.msk.f32.mxu1 %vm1271_vm1, %v1996_v0 }
  0x32   :  { %1081 = vmatmul.mubr.msk.f32.gmra.mxu0 %vm99_vm0, %v35_v25  ;;  %1177 = vmatmul.mubr.msk.f32.gmra.mxu1 %vm99_vm0, %v67_v26 }
  0x33   :  { %1083 = vmatprep.mubr.msk.f32.mxu0 %vm1271_vm1, %v1996_v0  ;;  %1179 = vmatprep.mubr.msk.f32.mxu1 %vm1271_vm1, %v1996_v0 }
  0x36   :  { %1084 = vmatmul.mubr.msk.f32.gmra.mxu0 %vm99_vm0, %v36_v27  ;;  %1180 = vmatmul.mubr.msk.f32.gmra.mxu1 %vm99_vm0, %v68_v28 }
  0x37   :  { %1086 = vmatprep.mubr.msk.f32.mxu0 %vm1271_vm1, %v1996_v0  ;;  %1182 = vmatprep.mubr.msk.f32.mxu1 %vm1271_vm1, %v1996_v0 }
  0x3a   :  { %1087 = vmatmul.mubr.msk.f32.gmra.mxu0 %vm99_vm0, %v37_v29  ;;  %1183 = vmatmul.mubr.msk.f32.gmra.mxu1 %vm99_vm0, %v69_v30  ;;  %v1725_v29 = vld [vmem:[%s1991_s2] ss:$0 sm:$0xff] }
  0x3b   :  { %1089 = vmatprep.mubr.msk.f32.mxu0 %vm1271_vm1, %v1996_v0  ;;  %1185 = vmatprep.mubr.msk.f32.mxu1 %vm1271_vm1, %v1996_v0 }
  0x3e   :  { %1090 = vmatmul.mubr.msk.f32.gmra.mxu0 %vm99_vm0, %v38_v31  ;;  %1186 = vmatmul.mubr.msk.f32.gmra.mxu1 %vm99_vm0, %v70_v32 }
  0x3f   :  { %1092 = vmatprep.mubr.msk.f32.mxu0 %vm1271_vm1, %v1996_v0  ;;  %1188 = vmatprep.mubr.msk.f32.mxu1 %vm1271_vm1, %v1996_v0 }
  0x42   :  { %1093 = vmatmul.mubr.msk.f32.gmra.mxu0 %vm99_vm0, %v39_v33  ;;  %1189 = vmatmul.mubr.msk.f32.gmra.mxu1 %vm99_vm0, %v71_v34 }
  0x43   :  { %1095 = vmatprep.mubr.msk.f32.mxu0 %vm1271_vm1, %v1996_v0  ;;  %1191 = vmatprep.mubr.msk.f32.mxu1 %vm1271_vm1, %v1996_v0 }
  0x46   :  { %1096 = vmatmul.mubr.msk.f32.gmra.mxu0 %vm99_vm0, %v40_v35  ;;  %1192 = vmatmul.mubr.msk.f32.gmra.mxu1 %vm99_vm0, %v72_v36 }
  0x47   :  { %1098 = vmatprep.mubr.msk.f32.mxu0 %vm1271_vm1, %v1996_v0  ;;  %1194 = vmatprep.mubr.msk.f32.mxu1 %vm1271_vm1, %v1996_v0 }
  0x4a   :  { %1099 = vmatmul.mubr.msk.f32.gmra.mxu0 %vm99_vm0, %v41_v37  ;;  %1195 = vmatmul.mubr.msk.f32.gmra.mxu1 %vm99_vm0, %v73_v38 }
  0x4b   :  { %1101 = vmatprep.mubr.msk.f32.mxu0 %vm1271_vm1, %v1996_v0  ;;  %1197 = vmatprep.mubr.msk.f32.mxu1 %vm1271_vm1, %v1996_v0 }
  0x4e   :  { %1102 = vmatmul.mubr.msk.f32.gmra.mxu0 %vm99_vm0, %v42_v39  ;;  %1198 = vmatmul.mubr.msk.f32.gmra.mxu1 %vm99_vm0, %v74_v40 }
  0x4f   :  { %1104 = vmatprep.mubr.msk.f32.mxu0 %vm1271_vm1, %v1996_v0  ;;  %1200 = vmatprep.mubr.msk.f32.mxu1 %vm1271_vm1, %v1996_v0 }
  0x52   :  { %1105 = vmatmul.mubr.msk.f32.gmra.mxu0 %vm99_vm0, %v43_v41  ;;  %1201 = vmatmul.mubr.msk.f32.gmra.mxu1 %vm99_vm0, %v75_v42 }
  0x53   :  { %1107 = vmatprep.mubr.msk.f32.mxu0 %vm1271_vm1, %v1996_v0  ;;  %1203 = vmatprep.mubr.msk.f32.mxu1 %vm1271_vm1, %v1996_v0 }
  0x56   :  { %1108 = vmatmul.mubr.msk.f32.gmra.mxu0 %vm99_vm0, %v44_v43  ;;  %1204 = vmatmul.mubr.msk.f32.gmra.mxu1 %vm99_vm0, %v76_v44 }
  0x57   :  { %1110 = vmatprep.mubr.msk.f32.mxu0 %vm1271_vm1, %v1996_v0  ;;  %1206 = vmatprep.mubr.msk.f32.mxu1 %vm1271_vm1, %v1996_v0 }
  0x5a   :  { %1111 = vmatmul.mubr.msk.f32.gmra.mxu0 %vm99_vm0, %v45_v45  ;;  %1207 = vmatmul.mubr.msk.f32.gmra.mxu1 %vm99_vm0, %v77_v46 }
  0x5b   :  { %1113 = vmatprep.mubr.msk.f32.mxu0 %vm1271_vm1, %v1996_v0  ;;  %1209 = vmatprep.mubr.msk.f32.mxu1 %vm1271_vm1, %v1996_v0 }
  0x5e   :  { %1114 = vmatmul.mubr.msk.f32.gmra.mxu0 %vm99_vm0, %v46_v47  ;;  %1210 = vmatmul.mubr.msk.f32.gmra.mxu1 %vm99_vm0, %v78_v48 }
  0x5f   :  { %1116 = vmatprep.mubr.msk.f32.mxu0 %vm1271_vm1, %v1996_v0  ;;  %1212 = vmatprep.mubr.msk.f32.mxu1 %vm1271_vm1, %v1996_v0 }
  0x62   :  { %1117 = vmatmul.mubr.msk.f32.gmra.mxu0 %vm99_vm0, %v47_v49  ;;  %1213 = vmatmul.mubr.msk.f32.gmra.mxu1 %vm99_vm0, %v79_v50 }
  0x63   :  { %1119 = vmatprep.mubr.msk.f32.mxu0 %vm1271_vm1, %v1996_v0  ;;  %1215 = vmatprep.mubr.msk.f32.mxu1 %vm1271_vm1, %v1996_v0 }
  0x66   :  { %1120 = vmatmul.mubr.msk.f32.gmra.mxu0 %vm99_vm0, %v48_v51  ;;  %1216 = vmatmul.mubr.msk.f32.gmra.mxu1 %vm99_vm0, %v80_v52 }
  0x67   :  { %1122 = vmatprep.mubr.msk.f32.mxu0 %vm1271_vm1, %v1996_v0  ;;  %1218 = vmatprep.mubr.msk.f32.mxu1 %vm1271_vm1, %v1996_v0 }
  0x6a   :  { %1123 = vmatmul.mubr.msk.f32.gmra.mxu0 %vm99_vm0, %v49_v53  ;;  %1219 = vmatmul.mubr.msk.f32.gmra.mxu1 %vm99_vm0, %v81_v54 }
  0x6b   :  { %1125 = vmatprep.mubr.msk.f32.mxu0 %vm1271_vm1, %v1996_v0  ;;  %1221 = vmatprep.mubr.msk.f32.mxu1 %vm1271_vm1, %v1996_v0 }
  0x6e   :  { %1126 = vmatmul.mubr.msk.f32.gmra.mxu0 %vm99_vm0, %v50_v55  ;;  %1222 = vmatmul.mubr.msk.f32.gmra.mxu1 %vm99_vm0, %v82_v56 }
  0x6f   :  { %1128 = vmatprep.mubr.msk.f32.mxu0 %vm1271_vm1, %v1996_v0  ;;  %1224 = vmatprep.mubr.msk.f32.mxu1 %vm1271_vm1, %v1996_v0 }
  0x72   :  { %1129 = vmatmul.mubr.msk.f32.gmra.mxu0 %vm99_vm0, %v51_v57  ;;  %1225 = vmatmul.mubr.msk.f32.gmra.mxu1 %vm99_vm0, %v83_v58 }
  0x73   :  { %1131 = vmatprep.mubr.msk.f32.mxu0 %vm1271_vm1, %v1996_v0  ;;  %1227 = vmatprep.mubr.msk.f32.mxu1 %vm1271_vm1, %v1996_v0 }
  0x76   :  { %1132 = vmatmul.mubr.msk.f32.gmra.mxu0 %vm99_vm0, %v52_v59  ;;  %1228 = vmatmul.mubr.msk.f32.gmra.mxu1 %vm99_vm0, %v84_v60 }
  0x77   :  { %1134 = vmatprep.mubr.msk.f32.mxu0 %vm1271_vm1, %v1996_v0  ;;  %1230 = vmatprep.mubr.msk.f32.mxu1 %vm1271_vm1, %v1996_v0 }
  0x7a   :  { %1135 = vmatmul.mubr.msk.f32.gmra.mxu0 %vm99_vm0, %v53_v61  ;;  %1231 = vmatmul.mubr.msk.f32.gmra.mxu1 %vm99_vm0, %v85_v62 }
  0x7b   :  { %1137 = vmatprep.mubr.msk.f32.mxu0 %vm1271_vm1, %v1996_v0  ;;  %1233 = vmatprep.mubr.msk.f32.mxu1 %vm1271_vm1, %v1996_v0 }
  0x7e   :  { %1138 = vmatmul.mubr.msk.f32.gmra.mxu0 %vm99_vm0, %v54_v63  ;;  %1234 = vmatmul.mubr.msk.f32.gmra.mxu1 %vm99_vm0, %v86_v1 }
  0x7f   :  { %1140 = vmatprep.mubr.msk.f32.mxu0 %vm1271_vm1, %v1996_v0  ;;  %1236 = vmatprep.mubr.msk.f32.mxu1 %vm1271_vm1, %v1996_v0 }
  0x82   :  { %1141 = vmatmul.mubr.msk.f32.gmra.mxu0 %vm99_vm0, %v55_v2  ;;  %1237 = vmatmul.mubr.msk.f32.gmra.mxu1 %vm99_vm0, %v87_v3 }
  0x83   :  { %1143 = vmatprep.mubr.msk.f32.mxu0 %vm1271_vm1, %v1996_v0  ;;  %1253 = vmatprep.mubr.msk.f32.mxu1 %vm1271_vm1, %v1996_v0 }
  0x86   :  { %1144 = vmatmul.mubr.msk.f32.gmra.mxu0 %vm99_vm0, %v56_v4 }
  0xca   :  { %v355_v5 = vpop.f32.mrf.mxu0  ;;  %v1708_v6 = vpop.f32.mrf.mxu1 }
  0xcb   :  { %v356_v34 = vadd.f32 %v1725_v29, %v355_v5 }
  0xcc   :  { %v1052_v7 = vpop.f32.mrf.mxu0  ;;  %v1148_v8 = vpop.f32.mrf.mxu1 }
  0xcd   :  { %v669_v40 = vmax.f32 %v356_v34, 0.0 }
  0xce   :  { %v360_v9 = vpop.f32.mrf.mxu0  ;;  %v1710_v10 = vpop.f32.mrf.mxu1 }
  0xcf   :  { %v361_v41 = vadd.f32 %v1725_v29, %v360_v9 }
  0xd0   :  { %v1055_v11 = vpop.f32.mrf.mxu0  ;;  %v1151_v12 = vpop.f32.mrf.mxu1 }
  0xd1   :  { %v670_v49 = vmax.f32 %v361_v41, 0.0 }
  0xd2   :  { %v365_v13 = vpop.f32.mrf.mxu0  ;;  %v1712_v14 = vpop.f32.mrf.mxu1 }
  0xd3   :  { %v366_v50 = vadd.f32 %v1725_v29, %v365_v13 }
  0xd4   :  { %v1058_v15 = vpop.f32.mrf.mxu0  ;;  %v1154_v16 = vpop.f32.mrf.mxu1 }
  0xd5   :  { %v671_v58 = vmax.f32 %v366_v50, 0.0 }
  0xd6   :  { %v370_v17 = vpop.f32.mrf.mxu0  ;;  %v1714_v18 = vpop.f32.mrf.mxu1 }
  0xd7   :  { %v371_v59 = vadd.f32 %v1725_v29, %v370_v17 }
  0xd8   :  { %v1061_v19 = vpop.f32.mrf.mxu0  ;;  %v1157_v20 = vpop.f32.mrf.mxu1 }
  0xd9   :  { %v672_v4 = vmax.f32 %v371_v59, 0.0 }
  0xda   :  { %v375_v21 = vpop.f32.mrf.mxu0  ;;  %v1716_v22 = vpop.f32.mrf.mxu1 }
  0xdb   :  { %v376_v5 = vadd.f32 %v1725_v29, %v375_v21 }
  0xdc   :  { %v1064_v23 = vpop.f32.mrf.mxu0  ;;  %v1160_v24 = vpop.f32.mrf.mxu1 }
  0xdd   :  { %v673_v16 = vmax.f32 %v376_v5, 0.0 }
  0xde   :  { %v1718_v25 = vpop.f32.mrf.mxu0  ;;  %v1720_v26 = vpop.f32.mrf.mxu1 }
  0xe0   :  { %v1067_v27 = vpop.f32.mrf.mxu0  ;;  %v1163_v28 = vpop.f32.mrf.mxu1 }
  0xe2   :  { %v1727_v30 = vpop.f32.mrf.mxu0  ;;  %v1729_v31 = vpop.f32.mrf.mxu1 }
  0xe4   :  { %v1070_v32 = vpop.f32.mrf.mxu0  ;;  %v1166_v33 = vpop.f32.mrf.mxu1 }
  0xe6   :  { %v390_v35 = vpop.f32.mrf.mxu0  ;;  %v1732_v36 = vpop.f32.mrf.mxu1 }
  0xe7   :  { %v391_v37 = vadd.f32 %v1725_v29, %v390_v35 }
  0xe8   :  { %v1073_v38 = vpop.f32.mrf.mxu0  ;;  %v1169_v39 = vpop.f32.mrf.mxu1 }
  0xe9   :  { %v676_v42 = vmax.f32 %v391_v37, 0.0 }
  0xea   :  { %v395_v43 = vpop.f32.mrf.mxu0  ;;  %v1736_v44 = vpop.f32.mrf.mxu1 }
  0xeb   :  { %v732_v45 = vmax.f32 %v669_v40, %v676_v42  ;;  %v396_v46 = vadd.f32 %v1725_v29, %v395_v43 }
  0xec   :  { %v1076_v47 = vpop.f32.mrf.mxu0  ;;  %v1172_v48 = vpop.f32.mrf.mxu1 }
  0xed   :  { %v677_v51 = vmax.f32 %v396_v46, 0.0 }
  0xee   :  { %v400_v52 = vpop.f32.mrf.mxu0  ;;  %v1740_v53 = vpop.f32.mrf.mxu1 }
  0xef   :  { %v733_v54 = vmax.f32 %v670_v49, %v677_v51  ;;  %v401_v55 = vadd.f32 %v1725_v29, %v400_v52 }
  0xf0   :  { %v1079_v56 = vpop.f32.mrf.mxu0  ;;  %v1175_v57 = vpop.f32.mrf.mxu1 }
  0xf1   :  { %v678_v60 = vmax.f32 %v401_v55, 0.0 }
  0xf2   :  { %v405_v61 = vpop.f32.mrf.mxu0  ;;  %v1744_v62 = vpop.f32.mrf.mxu1 }
  0xf3   :  { %v1746_v63 = vmax.f32 %v671_v58, %v678_v60  ;;  %v406_v1 = vadd.f32 %v1725_v29, %v405_v61 }
  0xf4   :  { %v1082_v2 = vpop.f32.mrf.mxu0  ;;  %v1178_v3 = vpop.f32.mrf.mxu1 }
  0xf5   :  { %v679_v7 = vmax.f32 %v406_v1, 0.0 }
  0xf6   :  { %v410_v8 = vpop.f32.mrf.mxu0  ;;  %v1750_v9 = vpop.f32.mrf.mxu1 }
  0xf7   :  { %v1752_v11 = vmax.f32 %v672_v4, %v679_v7  ;;  %v411_v12 = vadd.f32 %v1725_v29, %v410_v8 }
  0xf8   :  { %v1085_v13 = vpop.f32.mrf.mxu0  ;;  %v1181_v15 = vpop.f32.mrf.mxu1 }
  0xf9   :  { %v680_v17 = vmax.f32 %v411_v12, 0.0 }
  0xfa   :  { %v1755_v19 = vpop.f32.mrf.mxu0  ;;  %v1757_v20 = vpop.f32.mrf.mxu1 }
  0xfb   :  { %v1759_v23 = vmax.f32 %v673_v16, %v680_v17 }
  0xfc   :  { %v1088_v24 = vpop.f32.mrf.mxu0  ;;  %v1184_v21 = vpop.f32.mrf.mxu1 }
  0xfe   :  { %v1761_v27 = vpop.f32.mrf.mxu0  ;;  %v1763_v28 = vpop.f32.mrf.mxu1 }
 0x100   :  { %v1091_v32 = vpop.f32.mrf.mxu0  ;;  %v1187_v33 = vpop.f32.mrf.mxu1 }
 0x102   :  { %v425_v34 = vpop.f32.mrf.mxu0  ;;  %v1765_v35 = vpop.f32.mrf.mxu1 }
 0x103   :  { %v426_v37 = vadd.f32 %v1725_v29, %v425_v34 }
 0x104   :  { %v1094_v38 = vpop.f32.mrf.mxu0  ;;  %v1190_v39 = vpop.f32.mrf.mxu1 }
 0x105   :  { %v683_v40 = vmax.f32 %v426_v37, 0.0  ;;  %v516_v39 = vadd.f32 %v1725_v29, %v1708_v6  ;;  %v1822_v6 = vadd.f32 %v1725_v29, %v1716_v22 }
 0x106   :  { %v430_v41 = vpop.f32.mrf.mxu0  ;;  %v1768_v42 = vpop.f32.mrf.mxu1 }
 0x107   :  { %v1770_v43 = vmax.f32 %v732_v45, %v683_v40  ;;  %v431_v46 = vadd.f32 %v1725_v29, %v430_v41 }
 0x108   :  { %v1097_v47 = vpop.f32.mrf.mxu0  ;;  %v1193_v48 = vpop.f32.mrf.mxu1 }
 0x109   :  { %v684_v49 = vmax.f32 %v431_v46, 0.0  ;;  %v1805_v46 = vadd.f32 %v1725_v29, %v1710_v10  ;;  %v1809_v47 = vadd.f32 %v1725_v29, %v1712_v14  ;;  %v416_v10 = vadd.f32 %v1725_v29, %v1755_v19 }
 0x10a   :  { %v1773_v50 = vpop.f32.mrf.mxu0  ;;  %v1775_v51 = vpop.f32.mrf.mxu1  ;;  %v381_v14 = vadd.f32 %v1725_v29, %v1718_v25  ;;  %v386_v19 = vadd.f32 %v1725_v29, %v1727_v30  ;;  %v551_v25 = vadd.f32 %v1725_v29, %v1732_v36  ;;  %v1851_v36 = vadd.f32 %v1725_v29, %v1740_v53 }
 0x10b   :  { %v1777_v52 = vmax.f32 %v733_v54, %v684_v49  ;;  %v1814_v49 = vadd.f32 %v1725_v29, %v1714_v18 }
 0x10c   :  { %v1100_v55 = vpop.f32.mrf.mxu0  ;;  %v1196_v56 = vpop.f32.mrf.mxu1 }
 0x10e   :  { %v1779_v57 = vpop.f32.mrf.mxu0  ;;  %v1781_v58 = vpop.f32.mrf.mxu1 }
 0x110   :  { %v1103_v59 = vpop.f32.mrf.mxu0  ;;  %v1199_v45 = vpop.f32.mrf.mxu1 }
 0x111   :  { %v701_v59 = vmax.f32 %v516_v39, 0.0  ;;  %v1830_v45 = vadd.f32 %v1725_v29, %v1720_v26  ;;  %v421_v26 = vadd.f32 %v1725_v29, %v1761_v27 }
 0x112   :  { %v445_v60 = vpop.f32.mrf.mxu0  ;;  %v1783_v61 = vpop.f32.mrf.mxu1 }
 0x113   :  { %v446_v48 = vadd.f32 %v1725_v29, %v445_v60  ;;  %v706_v30 = vmax.f32 %v1830_v45, 0.0 }
 0x114   :  { %v1106_v1 = vpop.f32.mrf.mxu0  ;;  %v1202_v2 = vpop.f32.mrf.mxu1 }
 0x115   :  { %v702_v1 = vmax.f32 %v1805_v46, 0.0  ;;  %v703_v2 = vmax.f32 %v1809_v47, 0.0 }
 0x116   :  { %v450_v3 = vpop.f32.mrf.mxu0  ;;  %v1785_v4 = vpop.f32.mrf.mxu1 }
 0x117   :  { %v451_v22 = vadd.f32 %v1725_v29, %v450_v3  ;;  %v681_v3 = vmax.f32 %v416_v10, 0.0  ;;  %v675_v10 = vmax.f32 %v386_v19, 0.0 }
 0x118   :  { %v1109_v5 = vpop.f32.mrf.mxu0  ;;  %v1205_v7 = vpop.f32.mrf.mxu1 }
 0x119   :  { %v687_v5 = vmax.f32 %v446_v48, 0.0  ;;  %v704_v7 = vmax.f32 %v1814_v49, 0.0  ;;  %v688_v46 = vmax.f32 %v451_v22, 0.0 }
 0x11a   :  { %v455_v54 = vpop.f32.mrf.mxu0  ;;  %v1787_v8 = vpop.f32.mrf.mxu1 }
 0x11b   :  { %v456_v27 = vadd.f32 %v1725_v29, %v455_v54 }
 0x11c   :  { %v1112_v12 = vpop.f32.mrf.mxu0  ;;  %v1208_v13 = vpop.f32.mrf.mxu1 }
 0x11e   :  { %v1789_v15 = vpop.f32.mrf.mxu0  ;;  %v1791_v16 = vpop.f32.mrf.mxu1 }
 0x11f   :  { %v461_v22 = vadd.f32 %v1725_v29, %v1789_v15  ;;  %v596_v15 = vadd.f32 %v1725_v29, %v1775_v51 }
 0x120   :  { %v1115_v17 = vpop.f32.mrf.mxu0  ;;  %v1211_v24 = vpop.f32.mrf.mxu1 }
 0x121   :  { %v705_v17 = vmax.f32 %v1822_v6, 0.0  ;;  %v556_v24 = vadd.f32 %v1725_v29, %v1736_v44  ;;  %v743_v44 = vmax.f32 %v1759_v23, %v687_v5  ;;  %v436_v23 = vadd.f32 %v1725_v29, %v1773_v50 }
 0x122   :  { %v1793_v21 = vpop.f32.mrf.mxu0  ;;  %v1795_v32 = vpop.f32.mrf.mxu1  ;;  %v689_v5 = vmax.f32 %v456_v27, 0.0  ;;  %v591_v50 = vadd.f32 %v1725_v29, %v1768_v42 }
 0x123   :  { %v709_v54 = vmax.f32 %v556_v24, 0.0  ;;  %v466_v42 = vadd.f32 %v1725_v29, %v1793_v21  ;;  %v621_v21 = vadd.f32 %v1725_v29, %v1791_v16 }
 0x124   :  { %v1118_v33 = vpop.f32.mrf.mxu0  ;;  %v1214_v34 = vpop.f32.mrf.mxu1 }
 0x125   :  { %v674_v34 = vmax.f32 %v381_v14, 0.0  ;;  %v708_v14 = vmax.f32 %v551_v25, 0.0 }
 0x126   :  { %v1797_v37 = vpop.f32.mrf.mxu0  ;;  %v1799_v38 = vpop.f32.mrf.mxu1 }
 0x128   :  { %v1121_v40 = vpop.f32.mrf.mxu0  ;;  %v1217_v41 = vpop.f32.mrf.mxu1 }
 0x129   :  { %v1856_v41 = vadd.f32 %v1725_v29, %v1744_v62  ;;  %v710_v62 = vmax.f32 %v1851_v36, 0.0 }
 0x12a   :  { %v1816_v55 = vpop.f32.mrf.mxu0  ;;  %v1818_v56 = vpop.f32.mrf.mxu1 }
 0x12b   :  { %v476_v47 = vadd.f32 %v1725_v29, %v1816_v55 }
 0x12c   :  { %v1124_v18 = vpop.f32.mrf.mxu0  ;;  %v1220_v60 = vpop.f32.mrf.mxu1 }
 0x12d   :  { %v682_v18 = vmax.f32 %v421_v26, 0.0  ;;  %v586_v60 = vadd.f32 %v1725_v29, %v1765_v35  ;;  %v711_v35 = vmax.f32 %v1856_v41, 0.0  ;;  %v546_v41 = vadd.f32 %v1725_v29, %v1729_v31 }
 0x12e   :  { %v480_v12 = vpop.f32.mrf.mxu0  ;;  %v1842_v13 = vpop.f32.mrf.mxu1  ;;  %v581_v31 = vadd.f32 %v1725_v29, %v1763_v28  ;;  %v792_v28 = vld [vmem:[%s1992_s3 + $0x20] sm:$0xff] }
 0x12f   :  { %v481_v33 = vadd.f32 %v1725_v29, %v480_v12  ;;  %v715_v36 = vmax.f32 %v586_v60, 0.0 }
 0x130   :  { %v1127_v39 = vpop.f32.mrf.mxu0  ;;  %v1223_v40 = vpop.f32.mrf.mxu1 }
 0x131   :  { %v694_v48 = vmax.f32 %v481_v33, 0.0  ;;  %v737_v39 = vmax.f32 %v674_v34, %v681_v3  ;;  %v1872_v3 = vadd.f32 %v1725_v29, %v1750_v9  ;;  %v738_v34 = vmax.f32 %v675_v10, %v682_v18 }
 0x132   :  { %v485_v53 = vpop.f32.mrf.mxu0  ;;  %v1861_v12 = vpop.f32.mrf.mxu1  ;;  %v1883_v9 = vadd.f32 %v1725_v29, %v1779_v57  ;;  %v690_v10 = vmax.f32 %v461_v22, 0.0  ;;  %v601_v57 = vadd.f32 %v1725_v29, %v1781_v58 }
 0x133   :  { %v750_v40 = vmax.f32 %v743_v44, %v694_v48  ;;  %v486_v0 = vadd.f32 %v1725_v29, %v485_v53  ;;  %v744_v26 = vmax.f32 %v737_v39, %v688_v46  ;;  %v745_v46 = vmax.f32 %v738_v34, %v689_v5 }
 0x134   :  { %v1130_v19 = vpop.f32.mrf.mxu0  ;;  %v1226_v25 = vpop.f32.mrf.mxu1  ;;  %v712_v51 = vmax.f32 %v1872_v3, 0.0  ;;  %v686_v34 = vmax.f32 %v1883_v9, 0.0  ;;  %v718_v16 = vmax.f32 %v601_v57, 0.0 }
 0x135   :  { %v757_v33 = vmax.f32 %v750_v40, %v701_v59  ;;  %v695_v24 = vmax.f32 %v486_v0, 0.0  ;;  %v685_v0 = vmax.f32 %v436_v23, 0.0  ;;  %v471_v23 = vadd.f32 %v1725_v29, %v1797_v37 }
 0x136   :  { %v490_v27 = vpop.f32.mrf.mxu0  ;;  %v1876_v44 = vpop.f32.mrf.mxu1  ;;  %v691_v37 = vmax.f32 %v466_v42, 0.0 }
 0x137   :  { %v764_v48 = vmax.f32 %v757_v33, %v708_v14  ;;  %v751_v53 = vmax.f32 %v744_v26, %v695_v24  ;;  %v491_v59 = vadd.f32 %v1725_v29, %v490_v27  ;;  %v1892_v14 = vadd.f32 %v1725_v29, %v1757_v20 }
 0x138   :  { %v1133_v18 = vpop.f32.mrf.mxu0  ;;  %v1229_v60 = vpop.f32.mrf.mxu1  ;;  %v716_v33 = vmax.f32 %v591_v50, 0.0  ;;  %v741_v24 = vmax.f32 %v1746_v63, %v685_v0  ;;  %v717_v20 = vmax.f32 %v596_v15, 0.0  ;;  %v746_v27 = vmax.f32 %v1770_v43, %v690_v10 }
 0x139   :  { %v758_v39 = vmax.f32 %v751_v53, %v702_v1  ;;  %v696_v40 = vmax.f32 %v491_v59, 0.0  ;;  %v1887_v19 = vmax.f32 %v764_v48, %v715_v36  ;;  %v692_v59 = vmax.f32 %v471_v23, 0.0 }
 0x13a   :  { %v495_v5 = vpop.f32.mrf.mxu0  ;;  %v655_v22 = vpop.f32.mrf.mxu1  ;;  %v631_v63 = vadd.f32 %v1725_v29, %v1799_v38  ;;  %v722_v0 = vmax.f32 %v621_v21, 0.0  ;;  %v747_v42 = vmax.f32 %v1777_v52, %v691_v37  ;;  %v693_v52 = vmax.f32 %v476_v47, 0.0 }
 0x13b   :  { %v765_v1 = vmax.f32 %v758_v39, %v709_v54  ;;  %v752_v25 = vmax.f32 %v745_v46, %v696_v40  ;;  %v496_v26 = vadd.f32 %v1725_v29, %v495_v5  ;;  %v626_v54 = vadd.f32 %v1725_v29, %v1795_v32 }
 0x13c   :  { %v1136_v36 = vpop.f32.mrf.mxu0  ;;  %v1232_v58 = vpop.f32.mrf.mxu1  ;;  %v748_v57 = vmax.f32 %v741_v24, %v692_v59  ;;  %v724_v23 = vmax.f32 %v631_v63, 0.0 }
 0x13d   :  { %v759_v48 = vmax.f32 %v752_v25, %v703_v2  ;;  %v697_v53 = vmax.f32 %v496_v26, 0.0  ;;  %v656_v2 = vadd.f32 %v1725_v29, %v655_v22  ;;  %v772_v18 = vmax.f32 %v765_v1, %v716_v33 }
 0x13e   :  { %v500_v50 = vpop.f32.mrf.mxu0  ;;  %v660_v15 = vpop.f32.mrf.mxu1  ;;  %v723_v40 = vmax.f32 %v626_v54, 0.0  ;;  %v794_v54 = vld [vmem:[%s1992_s3 + $0x30] sm:$0xff] }
 0x13f   :  { %v766_v9 = vmax.f32 %v759_v48, %v710_v62  ;;  %v753_v46 = vmax.f32 %v746_v27, %v697_v53  ;;  %v501_v43 = vadd.f32 %v1725_v29, %v500_v50  ;;  %v661_v10 = vadd.f32 %v1725_v29, %v660_v15 }
 0x140   :  { %v1139_v32 = vpop.f32.mrf.mxu0  ;;  %v1235_v60 = vpop.f32.mrf.mxu1  ;;  %v729_v33 = vmax.f32 %v656_v2, 0.0  ;;  %v779_v49 = vmax.f32 %v772_v18, %v723_v40  ;;  %v778_v48 = vmax.f32 %v1887_v19, %v722_v0  ;;  %v713_v50 = vmax.f32 %v1892_v14, 0.0 }
 0x141   :  { %v760_v38 = vmax.f32 %v753_v46, %v704_v7  ;;  %v698_v39 = vmax.f32 %v501_v43, 0.0  ;;  %v773_v62 = vmax.f32 %v766_v9, %v717_v20  ;;  %v730_v5 = vmax.f32 %v661_v10, 0.0 }
 0x142   :  { %v505_v21 = vpop.f32.mrf.mxu0  ;;  %v665_v55 = vpop.f32.mrf.mxu1  ;;  %v785_v3 = vmax.f32 %v778_v48, %v729_v33  ;;  %v707_v46 = vmax.f32 %v546_v41, 0.0  ;;  %v606_v14 = vadd.f32 %v1725_v29, %v1783_v61  ;;  %v714_v10 = vmax.f32 %v581_v31, 0.0  ;;  %v788_v33 = vld [vmem:[%s1992_s3] sm:$0xff] }
 0x143   :  { %v767_v22 = vmax.f32 %v760_v38, %v711_v35  ;;  %v754_v25 = vmax.f32 %v747_v42, %v698_v39  ;;  %v506_v1 = vadd.f32 %v1725_v29, %v505_v21  ;;  %v666_v26 = vadd.f32 %v1725_v29, %v665_v55 }
 0x144   :  { %v780_v7 = vmax.f32 %v773_v62, %v724_v23  ;;  %v1142_v36 = vpop.f32.mrf.mxu0  ;;  %v1238_v20 = vpop.f32.mrf.mxu1  ;;  %v742_v35 = vmax.f32 %v1752_v11, %v686_v34  ;;  %v786_v53 = vmax.f32 %v779_v49, %v730_v5  ;;  %v611_v11 = vadd.f32 %v1725_v29, %v1785_v4  ;;  %v793_v34 = vld [vmem:[%s1992_s3 + $0x28] sm:$0xff]  ;;  %v791_v5 = vld [vmem:[%s1992_s3 + $0x18] sm:$0xff] }
 0x145   :  { %v1922_v58 = vmax.f32 %v767_v22, %v718_v16  ;;  %v761_v24 = vmax.f32 %v754_v25, %v705_v17  ;;  %v699_v27 = vmax.f32 %v506_v1, 0.0  ;;  %v731_v37 = vmax.f32 %v666_v26, 0.0  ;;  %v802_v36 = vld [vmem:[%s1993_s4] sm:$0x3] }
 0x146   :  { %v510_v59 = vpop.f32.mrf.mxu0  ;;  %v749_v19 = vmax.f32 %v742_v35, %v693_v52  ;;  %v616_v4 = vadd.f32 %v1725_v29, %v1787_v8  ;;  %v800_v43 = vmul.f32 %v793_v34, %v786_v53  ;;  %v720_v45 = vmax.f32 %v611_v11, 0.0 }
 0x147   :  { %v768_v16 = vmax.f32 %v761_v24, %v712_v51  ;;  %v755_v6 = vmax.f32 %v748_v57, %v699_v27  ;;  %v787_v17 = vmax.f32 %v780_v7, %v731_v37  ;;  %v511_v63 = vadd.f32 %v1725_v29, %v510_v59 }
 0x148   :  { %v1145_v15 = vpop.f32.mrf.mxu0  ;;  %v646_v18 = vadd.f32 %v1725_v29, %v1861_v12  ;;  %v651_v61 = vadd.f32 %v1725_v29, %v1876_v44  ;;  %v799_v32 = vmul.f32 %v792_v28, %v785_v3  ;;  %v719_v42 = vmax.f32 %v606_v14, 0.0 }
 0x149   :  { %v762_v51 = vmax.f32 %v755_v6, %v706_v30  ;;  %v801_v0 = vmul.f32 %v794_v54, %v787_v17  ;;  %v700_v9 = vmax.f32 %v511_v63, 0.0  ;;  %v1998_v30 = vmov 0.0  }
 0x14a   :  { %v721_v8 = vmax.f32 %v616_v4, 0.0  ;;  %v641_v38 = vadd.f32 %v1725_v29, %v1842_v13  ;;  %v636_v40 = vadd.f32 %v1725_v29, %v1818_v56  ;;  %v727_v12 = vmax.f32 %v646_v18, 0.0  ;;  %v790_v13 = vld [vmem:[%s1992_s3 + $0x10] sm:$0xff]  ;;  %v789_v56 = vld [vmem:[%s1992_s3 + $0x8] sm:$0xff] }
 0x14b   :  { %v769_v47 = vmax.f32 %v762_v51, %v713_v50  ;;  %v756_v2 = vmax.f32 %v749_v19, %v700_v9  ;;  %1240 = vmatpush3.msra.mxu1 %v801_v0  ;;  %v728_v44 = vmax.f32 %v651_v61, 0.0  ;;  %v775_v57 = vmax.f32 %v768_v16, %v719_v42 }
 0x14c   :  { %1241 = vmatprep.subr.mxu1 %v1998_v30  ;;  %v726_v21 = vmax.f32 %v641_v38, 0.0  ;;  %v725_v25 = vmax.f32 %v636_v40, 0.0  ;;  %v11_v20 = vstv %s1994_s5 }
 0x14d   :  { %v763_v60 = vmax.f32 %v756_v2, %v707_v46  ;;  %1242 = vmatpush3.msra.mxu1 %v800_v43  ;;  %v776_v39 = vmax.f32 %v769_v47, %v720_v45  ;;  %12 = vst [vmem:[#allocation2] sm:$0x1] %v11_v20 }
 0x14e   :  { %1243 = vmatprep.subr.mxu1 %v1998_v30  ;;  %v782_v29 = vmax.f32 %v775_v57, %v726_v21  ;;  %v781_v52 = vmax.f32 %v1922_v58, %v725_v25 }
 0x14f   :  { %v770_v62 = vmax.f32 %v763_v60, %v714_v10  ;;  %1244 = vmatpush3.msra.mxu1 %v799_v32  ;;  %v783_v22 = vmax.f32 %v776_v39, %v727_v12 }
 0x150   :  { %1245 = vmatprep.subr.mxu1 %v1998_v30  ;;  %v796_v49 = vmul.f32 %v789_v56, %v782_v29  ;;  %v795_v7 = vmul.f32 %v788_v33, %v781_v52 }
 0x151   :  { %v777_v23 = vmax.f32 %v770_v62, %v721_v8  ;;  %v797_v26 = vmul.f32 %v790_v13, %v783_v22 }
 0x153   :  { %v784_v55 = vmax.f32 %v777_v23, %v728_v44 }
 0x154   :  { %v966_v37 = vld [vmem:[#allocation2] ss:$0 sm:$0xff] }
 0x155   :  { %v798_v1 = vmul.f32 %v791_v5, %v784_v55 }
 0x157   :  { %1246 = vmatpush3.msra.mxu1 %v798_v1 }
 0x158   :  { %1247 = vmatprep.subr.mxu1 %v1998_v30 }
 0x159   :  { %1248 = vmatpush3.msra.mxu1 %v797_v26 }
 0x15a   :  { %1249 = vmatprep.subr.mxu1 %v1998_v30 }
 0x15b   :  { %1250 = vmatpush3.msra.mxu1 %v796_v49 }
 0x15c   :  { %1251 = vmatprep.subr.mxu1 %v1998_v30 }
 0x15d   :  { %1252 = vmatpush3.msra.mxu1 %v795_v7 }
 0x15e   :  { %1254 = vmatmul.mubr.msk.f32.vlgmr.msra.gmra.mxu1 %vm803_vm2, %v802_v36 }
 0x21e   :  { %v873_v58 = vpop.f32.mrf.mxu1 }
 0x21f   :  { %v878_v24 = vsel %vm877_vm3, %v873_v58, 0.0 }
 0x220   :  { %v1255_v27 = vpop.f32.mrf.mxu1  ;;  %879 = vadd.xlane.f32.xlu0 %v878_v24 }
 0x2a9   :  { %v880_v41 = vpop.xlane.xlu0 %879 }
 0x2aa   :  { %v888_v35 = vadd.f32 %v966_v37, %v880_v41 }
 0x2ac   :  { %v889_v48 = vsub.f32 0.0, %v888_v35 }
 0x2ae   :  { %v890_v53 = vmul.f32 1.442695, %v889_v48 }
 0x2b0   :  { %1266 = vpow2.f32 %v890_v53 }
 0x2bd   :  { %v1267_v54 = vpop.eup %1266 }
 0x2be   :  { %v892_v59 = vadd.f32 1.0, %v1267_v54 }
 0x2c0   :  { %1268 = vrcp.f32 %v892_v59 }
 0x2cd   :  { %v1269_v16 = vpop.eup %1268 }
 0x2ce   :  { %896 = vst.msk [vmem:[%s1995_s6] sm:$0x3] %vm895_vm4, %v1269_v16 }

</bundles_post_ra>
